<compile_context>
chip_gen: v7x
topology: tpu7x:2x2x1
jax: 0.10.0
libtpu: 0.0.40
codegen_flags: <defaults>
</compile_context>

<pallas_src>
import jax
import jax.numpy as jnp
from jax.experimental import pallas as pl
from jax.experimental.pallas import tpu as pltpu

BB = 8  # batch rows processed per grid step (sublane-sized group)


def attention_kernel(q_ref, feat_ref, wpsi_ref, bpsi_ref, attn_ref, ctx_ref):
    bb, T, D = feat_ref.shape
    H = wpsi_ref.shape[1]

    feat = feat_ref[...]                                        # (BB, T, D) bf16

    # comp_listener_feat = relu(psi(listener_feat)):
    # one (BB*T, D) @ (D, H) MXU matmul, f32 accumulation.
    k = jnp.dot(feat.reshape(bb * T, D), wpsi_ref[...],
                preferred_element_type=jnp.float32)             # (BB*T, H) f32
    k = jnp.maximum(k + bpsi_ref[...], 0.0)                     # bias + relu in f32
    k = k.reshape(bb, T, H).astype(jnp.bfloat16)                # (BB, T, H) bf16

    # energy = bmm(q, k^T): batched contraction on H -- no explicit k transpose.
    energy = jnp.einsum("bqh,bkh->bqk", q_ref[...], k,
                        preferred_element_type=jnp.float32)     # (BB, 1, T) f32

    # softmax over T (f32), approximate reciprocal on the EUP.
    m = jnp.max(energy, axis=-1, keepdims=True)
    e = jnp.exp(energy - m)
    attn = e * pl.reciprocal(jnp.sum(e, axis=-1, keepdims=True), approx=True)

    # context = attn @ listener_feat: batched contraction on T.
    ctx = jnp.einsum("bqk,bkd->bqd", attn.astype(jnp.bfloat16), feat,
                     preferred_element_type=jnp.float32)        # (BB, 1, D) f32

    attn_ref[...] = attn.astype(attn_ref.dtype)
    ctx_ref[...] = ctx.astype(ctx_ref.dtype)


def attention_layer_forward(decoder_state, listener_feat, params):
    """decoder_state: (B, 1, D) f32; listener_feat: (B, T, D) f32. multi_head == 1."""
    B, one, D = decoder_state.shape
    assert one == 1
    _, T, D2 = listener_feat.shape
    assert D == D2
    wphi, bphi, wpsi, bpsi = params                             # (D,H),(1,H),(D,H),(1,H)
    H = wpsi.shape[1]

    # phi projection hoisted out of the kernel: one batched (B, D)@(D, H) matmul.
    q = jax.nn.relu(decoder_state[:, 0, :] @ wphi + bphi)       # (B, H) f32
    q = q.astype(jnp.bfloat16)[:, None, :]                      # (B, 1, H) bf16
    feat = listener_feat.astype(jnp.bfloat16)                   # halve feat DMA traffic

    # Pad batch up to a multiple of the batch block (padded rows are sliced off below).
    B_pad = ((B + BB - 1) // BB) * BB
    if B_pad != B:
        pad = ((0, B_pad - B), (0, 0), (0, 0))
        q = jnp.pad(q, pad)
        feat = jnp.pad(feat, pad)

    attn, ctx = pl.pallas_call(
        attention_kernel,
        out_shape=(
            jax.ShapeDtypeStruct((B_pad, 1, T), jnp.float32),
            jax.ShapeDtypeStruct((B_pad, 1, D), jnp.float32),
        ),
        grid_spec=pltpu.PrefetchScalarGridSpec(
            num_scalar_prefetch=0,
            grid=(B_pad // BB,),
            in_specs=[
                pl.BlockSpec((BB, 1, H), lambda b: (b, 0, 0)),  # q = relu(phi(dec)), bf16
                pl.BlockSpec((BB, T, D), lambda b: (b, 0, 0)),  # listener_feat, bf16
                pl.BlockSpec((D, H), lambda b: (0, 0)),         # W_psi^T (constant block)
                pl.BlockSpec((1, H), lambda b: (0, 0)),         # b_psi   (constant block)
            ],
            out_specs=[
                pl.BlockSpec((BB, 1, T), lambda b: (b, 0, 0)),  # attention scores
                pl.BlockSpec((BB, 1, D), lambda b: (b, 0, 0)),  # context
            ],
        ),
        compiler_params=pltpu.CompilerParams(
            dimension_semantics=("parallel",),                  # batch blocks independent
            vmem_limit_bytes=64 * 1024 * 1024,
        ),
    )(q, feat, wpsi.astype(jnp.bfloat16), bpsi)

    attention_score = attn[:B, 0, :]   # (B, T) -- matches .squeeze(1) in the module
    context = ctx[:B, 0, :]            # (B, D)
    return [attention_score], context


def init_params(key, input_dim, hidden_dim):
    """Deterministic PyTorch-Linear-style init. Weights returned pre-transposed (D, H)."""
    k1, k2, k3, k4 = jax.random.split(key, 4)
    bound = 1.0 / jnp.sqrt(jnp.float32(input_dim))
    wphi = jax.random.uniform(k1, (input_dim, hidden_dim), jnp.float32, -bound, bound)
    bphi = jax.random.uniform(k2, (1, hidden_dim), jnp.float32, -bound, bound)
    wpsi = jax.random.uniform(k3, (input_dim, hidden_dim), jnp.float32, -bound, bound)
    bpsi = jax.random.uniform(k4, (1, hidden_dim), jnp.float32, -bound, bound)
    return wphi, bphi, wpsi, bpsi


def reference_forward_f32(decoder_state, listener_feat, params):
    """Module-exact all-f32 reference (matches the PyTorch forward)."""
    wphi, bphi, wpsi, bpsi = params
    q = jax.nn.relu(decoder_state @ wphi + bphi)                 # (B, 1, H)
    k = jax.nn.relu(listener_feat @ wpsi + bpsi)                 # (B, T, H)
    energy = jnp.einsum("bqh,bth->bqt", q, k)[:, 0, :]           # (B, T)
    attn = jax.nn.softmax(energy, axis=-1)
    ctx = jnp.sum(listener_feat * attn[:, :, None], axis=1)      # (B, D)
    return attn, ctx


def reference_forward_mirrored(decoder_state, listener_feat, params):
    """Mirrors the kernel's bf16-input / f32-accumulate precision choices."""
    wphi, bphi, wpsi, bpsi = params
    q = jax.nn.relu(decoder_state[:, 0, :] @ wphi + bphi).astype(jnp.bfloat16)  # (B, H)
    feat = listener_feat.astype(jnp.bfloat16)
    k = jnp.einsum("btd,dh->bth", feat, wpsi.astype(jnp.bfloat16),
                   preferred_element_type=jnp.float32) + bpsi
    k = jnp.maximum(k, 0.0).astype(jnp.bfloat16)
    energy = jnp.einsum("bh,bth->bt", q, k, preferred_element_type=jnp.float32)
    attn = jax.nn.softmax(energy, axis=-1)
    ctx = jnp.einsum("bt,btd->bd", attn.astype(jnp.bfloat16), feat,
                     preferred_element_type=jnp.float32)
    return attn, ctx


if __name__ == "__main__":
    B, T, D, H = 3, 8, 32, 16   # small shapes; B=3 also exercises the pad-to-8 path
    key = jax.random.PRNGKey(0)
    kd, kf, kp = jax.random.split(key, 3)

    decoder_state = jax.random.normal(kd, (B, 1, D), jnp.float32)
    listener_feat = jax.random.normal(kf, (B, T, D), jnp.float32)
    params = init_params(kp, D, H)

    (attn_scores,), context = attention_layer_forward(decoder_state, listener_feat, params)
    jax.block_until_ready(attn_scores)
    jax.block_until_ready(context)

    # Tight check against a reference mirroring the kernel's bf16/f32 precision.
    m_attn, m_ctx = reference_forward_mirrored(decoder_state, listener_feat, params)
    assert jnp.allclose(attn_scores, m_attn, atol=1e-2, rtol=1e-2)
    assert jnp.allclose(context, m_ctx, atol=1e-2, rtol=1e-2)

    # Loose sanity check against the module-exact f32 math (bf16 input tolerance).
    f_attn, f_ctx = reference_forward_f32(decoder_state, listener_feat, params)
    assert jnp.allclose(attn_scores, f_attn, atol=1e-1, rtol=1e-1)
    assert jnp.allclose(context, f_ctx, atol=1e-1, rtol=1e-1)

    print("KERNEL_OK")
</pallas_src>

<mosaic_0001>
module attributes {stable_mosaic.version = 11 : i64} {
  func.func @attention_kernel(%arg0: i32, %arg1: memref<8x1x16xbf16, #tpu.memory_space<vmem>>, %arg2: memref<8x8x32xbf16, #tpu.memory_space<vmem>>, %arg3: memref<32x16xbf16, #tpu.memory_space<vmem>>, %arg4: memref<1x16xf32, #tpu.memory_space<vmem>>, %arg5: memref<8x1x8xf32, #tpu.memory_space<vmem>>, %arg6: memref<8x1x32xf32, #tpu.memory_space<vmem>>) attributes {dimension_semantics = [#tpu.dimension_semantics<parallel>], iteration_bounds = array<i64: 1>, scalar_prefetch = 0 : i64, scratch_operands = 0 : i64, tpu.core_type = #tpu.core_type<tc>, window_params = [{transform_indices = @transform_0, window_bounds = array<i64: 8, 1, 16>}, {transform_indices = @transform_1, window_bounds = array<i64: 8, 8, 32>}, {pipeline_mode = #tpu.pipeline_mode<synchronous>, transform_indices = @transform_2, window_bounds = array<i64: 32, 16>}, {pipeline_mode = #tpu.pipeline_mode<synchronous>, transform_indices = @transform_3, window_bounds = array<i64: 1, 16>}, {transform_indices = @transform_4, window_bounds = array<i64: 8, 1, 8>}, {transform_indices = @transform_5, window_bounds = array<i64: 8, 1, 32>}]} {
    %c0 = arith.constant 0 : index
    %c0_0 = arith.constant 0 : index
    %c0_1 = arith.constant 0 : index
    %0 = vector.load %arg2[%c0, %c0_0, %c0_1] : memref<8x8x32xbf16, #tpu.memory_space<vmem>>, vector<8x8x32xbf16>
    %1 = vector.shape_cast %0 : vector<8x8x32xbf16> to vector<64x32xbf16>
    %c0_2 = arith.constant 0 : index
    %c0_3 = arith.constant 0 : index
    %2 = vector.load %arg3[%c0_2, %c0_3] : memref<32x16xbf16, #tpu.memory_space<vmem>>, vector<32x16xbf16>
    %cst = arith.constant dense<0.000000e+00> : vector<64x16xf32>
    %3 = tpu.matmul %1, %2, %cst {dimension_numbers = #tpu.dot_dimension_numbers<[1], [0], [0], [1], [0, 0, 1, 1], [], []>} : vector<64x32xbf16>, vector<32x16xbf16>, vector<64x16xf32> -> vector<64x16xf32>
    %c0_4 = arith.constant 0 : index
    %c0_5 = arith.constant 0 : index
    %4 = vector.load %arg4[%c0_4, %c0_5] : memref<1x16xf32, #tpu.memory_space<vmem>>, vector<1x16xf32>
    %5 = vector.broadcast %4 : vector<1x16xf32> to vector<64x16xf32>
    %6 = arith.addf %3, %5 : vector<64x16xf32>
    %cst_6 = arith.constant 0.000000e+00 : f32
    %7 = vector.broadcast %cst_6 : f32 to vector<64x16xf32>
    %8 = arith.maximumf %6, %7 : vector<64x16xf32>
    %9 = vector.shape_cast %8 : vector<64x16xf32> to vector<8x8x16xf32>
    %10 = arith.truncf %9 : vector<8x8x16xf32> to vector<8x8x16xbf16>
    %c0_7 = arith.constant 0 : index
    %c0_8 = arith.constant 0 : index
    %c0_9 = arith.constant 0 : index
    %11 = vector.load %arg1[%c0_7, %c0_8, %c0_9] : memref<8x1x16xbf16, #tpu.memory_space<vmem>>, vector<8x1x16xbf16>
    "tpu.trace_start"() <{level = 10 : i32, message = "bqh,bkh->bqk"}> : () -> ()
    %cst_10 = arith.constant dense<0.000000e+00> : vector<8x1x8xf32>
    %12 = tpu.matmul %11, %10, %cst_10 {dimension_numbers = #tpu.dot_dimension_numbers<[2], [2], [1], [1], [0, 0, 0, 1, 1, 1], [0], [0]>} : vector<8x1x16xbf16>, vector<8x8x16xbf16>, vector<8x1x8xf32> -> vector<8x1x8xf32>
    "tpu.trace_stop"() : () -> ()
    %cst_11 = arith.constant dense<0xFF800000> : vector<8x1xf32>
    %13 = vector.multi_reduction <maximumf>, %12, %cst_11 [2] : vector<8x1x8xf32> to vector<8x1xf32>
    %14 = vector.shape_cast %13 : vector<8x1xf32> to vector<8x1x1xf32>
    %15 = vector.broadcast %14 : vector<8x1x1xf32> to vector<8x1x8xf32>
    %16 = arith.subf %12, %15 : vector<8x1x8xf32>
    %17 = math.exp %16 : vector<8x1x8xf32>
    %cst_12 = arith.constant dense<0.000000e+00> : vector<8x1xf32>
    %18 = vector.multi_reduction <add>, %17, %cst_12 [2] : vector<8x1x8xf32> to vector<8x1xf32>
    %19 = vector.shape_cast %18 : vector<8x1xf32> to vector<8x1x1xf32>
    %20 = tpu.reciprocal %19 {approx = true} : vector<8x1x1xf32> -> vector<8x1x1xf32>
    %21 = vector.broadcast %20 : vector<8x1x1xf32> to vector<8x1x8xf32>
    %22 = arith.mulf %17, %21 : vector<8x1x8xf32>
    %23 = arith.truncf %22 : vector<8x1x8xf32> to vector<8x1x8xbf16>
    "tpu.trace_start"() <{level = 10 : i32, message = "bqk,bkd->bqd"}> : () -> ()
    %cst_13 = arith.constant dense<0.000000e+00> : vector<8x1x32xf32>
    %24 = tpu.matmul %23, %0, %cst_13 {dimension_numbers = #tpu.dot_dimension_numbers<[2], [1], [1], [2], [0, 0, 0, 1, 1, 2], [0], [0]>} : vector<8x1x8xbf16>, vector<8x8x32xbf16>, vector<8x1x32xf32> -> vector<8x1x32xf32>
    "tpu.trace_stop"() : () -> ()
    %c0_14 = arith.constant 0 : index
    %c0_15 = arith.constant 0 : index
    %c0_16 = arith.constant 0 : index
    %25 = vector.load %arg5[%c0_14, %c0_15, %c0_16] : memref<8x1x8xf32, #tpu.memory_space<vmem>>, vector<8x1x8xf32>
    tpu.vector_store %arg5[%c0_14, %c0_15, %c0_16], %22 {strides = array<i32>} : memref<8x1x8xf32, #tpu.memory_space<vmem>>, vector<8x1x8xf32>,
    %c0_17 = arith.constant 0 : index
    %c0_18 = arith.constant 0 : index
    %c0_19 = arith.constant 0 : index
    %26 = vector.load %arg6[%c0_17, %c0_18, %c0_19] : memref<8x1x32xf32, #tpu.memory_space<vmem>>, vector<8x1x32xf32>
    tpu.vector_store %arg6[%c0_17, %c0_18, %c0_19], %24 {strides = array<i32>} : memref<8x1x32xf32, #tpu.memory_space<vmem>>, vector<8x1x32xf32>,
    return
  }
  func.func @transform_0(%arg0: i32) -> (i32, i32, i32) {
    %c0_i32 = arith.constant 0 : i32
    %c0_i32_0 = arith.constant 0 : i32
    %c0_i32_1 = arith.constant 0 : i32
    return %arg0, %c0_i32, %c0_i32_0 : i32, i32, i32
  }
  func.func @transform_1(%arg0: i32) -> (i32, i32, i32) {
    %c0_i32 = arith.constant 0 : i32
    %c0_i32_0 = arith.constant 0 : i32
    %c0_i32_1 = arith.constant 0 : i32
    return %arg0, %c0_i32, %c0_i32_0 : i32, i32, i32
  }
  func.func @transform_2(%arg0: i32) -> (i32, i32) {
    %c0_i32 = arith.constant 0 : i32
    %c0_i32_0 = arith.constant 0 : i32
    %c0_i32_1 = arith.constant 0 : i32
    return %c0_i32, %c0_i32_0 : i32, i32
  }
  func.func @transform_3(%arg0: i32) -> (i32, i32) {
    %c0_i32 = arith.constant 0 : i32
    %c0_i32_0 = arith.constant 0 : i32
    %c0_i32_1 = arith.constant 0 : i32
    return %c0_i32, %c0_i32_0 : i32, i32
  }
  func.func @transform_4(%arg0: i32) -> (i32, i32, i32) {
    %c0_i32 = arith.constant 0 : i32
    %c0_i32_0 = arith.constant 0 : i32
    %c0_i32_1 = arith.constant 0 : i32
    return %arg0, %c0_i32, %c0_i32_0 : i32, i32, i32
  }
  func.func @transform_5(%arg0: i32) -> (i32, i32, i32) {
    %c0_i32 = arith.constant 0 : i32
    %c0_i32_0 = arith.constant 0 : i32
    %c0_i32_1 = arith.constant 0 : i32
    return %arg0, %c0_i32, %c0_i32_0 : i32, i32, i32
  }
}

</mosaic_0001>

<bundles_post_ra>
// kernel: tpu_custom_call.1
= control target key start
LH: loop header
LB: loop body
LE: loop exit
PB: predicated region body
PF: predicated region fallthrough
CT: control target
= control target key end

     0   :  { %11 = vsyncpa [#allocation3], 0  ;;  %s1774_s0 = inlined_call_operand.hbm [shape: bf16[8,1,16], index: 0, kind: input, shape index: {}]   ;;  %s1775_s1 = inlined_call_operand.hbm [shape: bf16[8,8,32], index: 1, kind: input, shape index: {}]   ;;  %s1776_s2 = inlined_call_operand.hbm [shape: bf16[32,16], index: 2, kind: input, shape index: {}]   ;;  %s1777_s3 = inlined_call_operand.hbm [shape: f32[1,16], index: 3, kind: input, shape index: {}]   ;;  %s1778_s4 = inlined_call_operand.hbm [shape: f32[8,1,8], index: 4, kind: output, shape index: {0}]   ;;  %s1779_s5 = inlined_call_operand.hbm [shape: f32[8,1,32], index: 5, kind: output, shape index: {1}]  }
   0x1   :  { %12 = vsyncpa [#allocation6], 0 }
   0x2   :  { %13 = vsyncpa [#allocation9], 0 }
   0x3   :  { %14 = vsyncpa [#allocation4], 0 }
   0x4   :  { %15 = vsyncpa [#allocation12], 0  ;;  %s1481_s18 = smov [#allocation5]   ;;  %s1339_s22 = scalar_lea.hbm %s1775_s1, 512 }
   0x5   :  { %s33_s19 = sshll.u32 %s1481_s18, 4  ;;  %p1340_p0 = scmp.ne.s32.totalorder %s1775_s1, %s1339_s22  ;;  %s34_s19 = int_to_ptr.vmem [resolvable:$true] %s33_s19 }
   0x6   :  { %p1343_p1 = scmp.lt.u32.totalorder %s1339_s22, %s1775_s1 }
   0x8   :  { %p1345_p2 = pnand %p1343_p1, %p1340_p0 }
   0xa   :  { %1348 = shalt.err (!%p1345_p2)
}
   0xb   :  { %s1349_s27 = scalar_lea.vmem %s34_s19, 512  ;;  %p1354_p4 = scmp.lt.s32.totalorder %s34_s19, %s34_s19 }
   0xc   :  { %p1350_p3 = scmp.ne.s32.totalorder %s34_s19, %s1349_s27  ;;  %p1355_p5 = scmp.lt.s32.totalorder %s1349_s27, %s1349_s27 }
   0xe   :  { %p1356_p6 = por %p1355_p5, %p1354_p4 }
  0x10   :  { %p1357_p7 = pnand %p1356_p6, %p1350_p3 }
  0x12   :  { %1360 = shalt.err (!%p1357_p7)
}
  0x13   :  { %s1482_s28 = smov 64   ;;  %s1483_s29 = smov 4  }
  0x14   :  { %39 = dma.hbm_to_vmem [thread:$0]  %s1775_s1, 512, %s34_s19, [#allocation6], %s1482_s28, %s1482_s28, %s1483_s29  }
  0x15   :  { %s1484_s7 = smov [#allocation2]   ;;  %s1361_s11 = scalar_lea.hbm %s1774_s0, 128 }
  0x16   :  { %s21_s8 = sshll.u32 %s1484_s7, 4  ;;  %p1362_p8 = scmp.ne.s32.totalorder %s1774_s0, %s1361_s11  ;;  %s22_s8 = int_to_ptr.vmem [resolvable:$true] %s21_s8 }
  0x17   :  { %p1365_p9 = scmp.lt.u32.totalorder %s1361_s11, %s1774_s0 }
  0x19   :  { %p1367_p10 = pnand %p1365_p9, %p1362_p8 }
  0x1b   :  { %1370 = shalt.err (!%p1367_p10)
}
  0x1c   :  { %s1371_s16 = scalar_lea.vmem %s22_s8, 128  ;;  %p1376_p12 = scmp.lt.s32.totalorder %s22_s8, %s22_s8 }
  0x1d   :  { %p1372_p11 = scmp.ne.s32.totalorder %s22_s8, %s1371_s16  ;;  %p1377_p13 = scmp.lt.s32.totalorder %s1371_s16, %s1371_s16 }
  0x1f   :  { %p1378_p0 = por %p1377_p13, %p1376_p12 }
  0x21   :  { %p1379_p1 = pnand %p1378_p0, %p1372_p11 }
  0x23   :  { %1382 = shalt.err (!%p1379_p1)
}
  0x24   :  { %s1485_s1 = smov 16   ;;  %s1486_s17 = smov 1  }
  0x25   :  { %27 = dma.hbm_to_vmem [thread:$0]  %s1774_s0, 128, %s22_s8, [#allocation3], %s1485_s1, %s1485_s1, %s1486_s17  }
  0x26   :  { %s1487_s20 = smov [#allocation7]   ;;  %s1488_s22 = smov [#allocation8]  }
  0x27   :  { %s45_s21 = sshll.u32 %s1487_s20, 4  ;;  %s58_s23 = sshll.u32 %s1488_s22, 4  ;;  %s46_s21 = int_to_ptr.vmem [resolvable:$true] %s45_s21  ;;  %s59_s23 = int_to_ptr.vmem [resolvable:$true] %s58_s23 }
  0x28   :  { %s1383_s26 = scalar_lea.hbm %s1776_s2, 256 }
  0x29   :  { %p1384_p2 = scmp.ne.s32.totalorder %s1776_s2, %s1383_s26  ;;  %p1387_p3 = scmp.lt.u32.totalorder %s1383_s26, %s1776_s2 }
  0x2b   :  { %p1389_p4 = pnand %p1387_p3, %p1384_p2 }
  0x2d   :  { %1392 = shalt.err (!%p1389_p4)
}
  0x2e   :  { %s1393_s0 = scalar_lea.vmem %s46_s21, 256  ;;  %p1398_p6 = scmp.lt.s32.totalorder %s46_s21, %s46_s21 }
  0x2f   :  { %p1394_p5 = scmp.ne.s32.totalorder %s46_s21, %s1393_s0  ;;  %p1399_p7 = scmp.lt.s32.totalorder %s1393_s0, %s1393_s0 }
  0x31   :  { %p1400_p8 = por %p1399_p7, %p1398_p6 }
  0x33   :  { %p1401_p9 = pnand %p1400_p8, %p1394_p5 }
  0x35   :  { %1404 = shalt.err (!%p1401_p9)
}
  0x36   :  { %51 = dma.hbm_to_vmem [thread:$0]  %s1776_s2, 256, %s46_s21, [#allocation6], %s1482_s28, %s1482_s28, %s1483_s29  }
  0x37   :  { %s1405_s12 = scalar_lea.hbm %s1777_s3, 16 }
  0x38   :  { %p1406_p10 = scmp.ne.s32.totalorder %s1777_s3, %s1405_s12  ;;  %p1409_p11 = scmp.lt.u32.totalorder %s1405_s12, %s1777_s3 }
  0x3a   :  { %p1411_p12 = pnand %p1409_p11, %p1406_p10 }
  0x3c   :  { %1414 = shalt.err (!%p1411_p12)
}
  0x3d   :  { %s1415_s18 = scalar_lea.vmem %s59_s23, 16  ;;  %s1419_s19 = scalar_lea.vmem %s59_s23, 32 }
  0x3e   :  { %p1416_p13 = scmp.ne.s32.totalorder %s59_s23, %s1415_s18  ;;  %p1420_p0 = scmp.lt.s32.totalorder %s59_s23, %s59_s23 }
  0x3f   :  { %p1421_p1 = scmp.lt.s32.totalorder %s1419_s19, %s1415_s18 }
  0x41   :  { %p1422_p2 = por %p1421_p1, %p1420_p0 }
  0x43   :  { %p1423_p3 = pnand %p1422_p2, %p1416_p13 }
  0x45   :  { %1426 = shalt.err (!%p1423_p3)
}
  0x46   :  { %61 = dma.hbm_to_vmem [thread:$0]  %s1777_s3, 16, %s59_s23, [#allocation9]  }
  0x47   :  { %1471 = dma.done.wait [#allocation3], 128  }
  0x48   :  { %1472 = vsyncadd [#allocation3], 4294967168 }
  0x49   :  { %1473 = dma.done.wait [#allocation6], 768  }
  0x4a   :  { %1474 = vsyncadd [#allocation6], 4294966528 }
  0x4b   :  { %1475 = dma.done.wait [#allocation9], 16  }
  0x4c   :  { %1476 = vsyncadd [#allocation9], 4294967280  ;;  %v1301_v0 = vld [vmem:[#allocation7] sm:$0xff]   ;;  %v1302_v1 = vld [vmem:[#allocation7 + $0x8] sm:$0xff]   ;;  %vm126_vm0 = vcmask 261120   ;;  %v1489_v14 = vmov 0.0  }
  0x4d   :  { %1181 = vmatprep.subr.bf16.mxu0 %v1301_v0  ;;  %v1580_v2 = vld [vmem:[#allocation5] sm:$0xf]  ;;  %v1582_v3 = vld [vmem:[#allocation5 + $0x4] sm:$0xf]  ;;  %v1586_v5 = vld [vmem:[#allocation5 + $0x8] sm:$0xf]  ;;  %1193 = vmatprep.subr.bf16.mxu1 %v1489_v14 }
  0x4e   :  { %1182 = vmatpush3.bf16.msra.mxu0 %v1301_v0  ;;  %v1117_v4 = vcombine.low %v1580_v2, %v1582_v3  ;;  %v1588_v6 = vld [vmem:[#allocation5 + $0xc] sm:$0xf]  ;;  %v1590_v7 = vld [vmem:[#allocation5 + $0x10] sm:$0xf]  ;;  %v1592_v8 = vld [vmem:[#allocation5 + $0x14] sm:$0xf] }
  0x4f   :  { %1183 = vmatprep.subr.bf16.mxu0 %v1302_v1  ;;  %v1118_v9 = vcombine.low %v1586_v5, %v1588_v6  ;;  %v1119_v10 = vcombine.low %v1590_v7, %v1592_v8  ;;  %v1601_v11 = vld [vmem:[#allocation5 + $0x18] sm:$0xf]  ;;  %v1603_v12 = vld [vmem:[#allocation5 + $0x1c] sm:$0xf]  ;;  %vm1490_vm1 = vmmov 0   ;;  %vm228_vm2 = vcmask 130048  }
  0x50   :  { %1185 = vmatprep.mubr.msk.bf16.mxu0 %vm126_vm0, %v1117_v4  ;;  %v1120_v13 = vcombine.low %v1601_v11, %v1603_v12  ;;  %1195 = vmatprep.mubr.msk.bf16.mxu1 %vm1490_vm1, %v1489_v14  ;;  %v1116_v15 = vld [vmem:[#allocation8] ss:$0 sm:$0xff]  ;;  %v222_v39 = vld [vmem:[#allocation2 + $0x2] sm:$0x1]  ;;  %v220_v40 = vld [vmem:[#allocation2] sm:$0x1] }
  0x51   :  { %v221_v49 = vld [vmem:[#allocation2 + $0x1] sm:$0x1]  ;;  %v224_v50 = vld [vmem:[#allocation2 + $0x4] sm:$0x1]  ;;  %v223_v56 = vld [vmem:[#allocation2 + $0x3] sm:$0x1] }
  0x52   :  { %1184 = vmatpush3.bf16.msra.mxu0 %v1302_v1  ;;  %v226_v57 = vld [vmem:[#allocation2 + $0x6] sm:$0x1]  ;;  %v225_v61 = vld [vmem:[#allocation2 + $0x5] sm:$0x1]  ;;  %v227_v63 = vld [vmem:[#allocation2 + $0x7] sm:$0x1] }
  0x53   :  { %1205 = vmatprep.subr.bf16.mxu0 %v1489_v14  ;;  %vm597_vm3 = vcmask 57344   ;;  %vm698_vm4 = vcmask 1043456   ;;  %vm694_vm5 = vcmask 64512   ;;  %s1491_s3 = smov [#allocation10]  }
  0x54   :  { %s1086_s29 = sshll.u32 %s1491_s3, 4  ;;  %s1087_s29 = int_to_ptr.vmem [resolvable:$true] %s1086_s29 }
  0x55   :  { %1186 = vmatmul.mubr.msk.bf16.vlgmr.msra.gmra.mrb[0].mxu0 %vm126_vm0, %v1118_v9  ;;  %s1427_s20 = scalar_lea.vmem %s1087_s29, 128  ;;  %p1432_p5 = scmp.lt.s32.totalorder %s1087_s29, %s1087_s29 }
  0x56   :  { %1189 = vmatprep.mubr.msk.bf16.mxu0 %vm126_vm0, %v1119_v10  ;;  %p1428_p4 = scmp.ne.s32.totalorder %s1087_s29, %s1427_s20  ;;  %p1433_p6 = scmp.lt.s32.totalorder %s1427_s20, %s1427_s20 }
  0x58   :  { %p1434_p7 = por %p1433_p6, %p1432_p5 }
  0x5a   :  { %p1435_p8 = pnand %p1434_p7, %p1428_p4 }
  0x5d   :  { %1190 = vmatmul.mubr.msk.bf16.gmra.mrb[4].mxu0 %vm126_vm0, %v1120_v13 }
  0x5e   :  { %1207 = vmatprep.mubr.msk.bf16.mxu0 %vm1490_vm1, %v1489_v14 }
 0x128   :  { %v1187_v16 = vpop.f32.mrb[0].mxu0 }
 0x129   :  { %v182_v17 = vadd.f32 %v1187_v16, %v1116_v15  ;;  %v173_v18 = vpop.f32.mrb[1].mxu0 }
 0x12a   :  { %v174_v19 = vadd.f32 %v1116_v15, %v173_v18  ;;  %v1188_v20 = vpop.f32.mrb[2].mxu0 }
 0x12b   :  { %v206_v21 = vmax.f32 %v182_v17, 0.0  ;;  %v176_v22 = vpop.f32.mrb[3].mxu0  ;;  %v185_v36 = vadd.f32 %v1188_v20, %v1116_v15 }
 0x12c   :  { %v204_v23 = vmax.f32 %v174_v19, 0.0  ;;  %v177_v24 = vadd.f32 %v1116_v15, %v176_v22 }
 0x12d   :  { %v214_v25 = vpack.c.bf16 %v206_v21, %v206_v21  ;;  %v207_v43 = vmax.f32 %v185_v36, 0.0 }
 0x12e   :  { %v212_v26 = vpack.c.bf16 %v204_v23, %v204_v23  ;;  %v205_v28 = vmax.f32 %v177_v24, 0.0 }
 0x12f   :  { %v325_v27 = vsel %vm228_vm2, %v214_v25, 0  ;;  %v215_v47 = vpack.c.bf16 %v207_v43, %v207_v43 }
 0x130   :  { %v1191_v29 = vpop.f32.mrb[4].mxu0  ;;  %1206 = vmatpush3.bf16.xpose.msra.mxu0 %v325_v27  ;;  %v233_v30 = vsel %vm228_vm2, %v212_v26, 0  ;;  %v213_v37 = vpack.c.bf16 %v205_v28, %v205_v28 }
 0x131   :  { %v189_v31 = vpop.f32.mrb[5].mxu0  ;;  %1194 = vmatpush3.bf16.xpose.msra.mxu1 %v233_v30  ;;  %1217 = vmatprep.subr.bf16.mxu0 %v1489_v14  ;;  %v198_v32 = vadd.f32 %v1191_v29, %v1116_v15  ;;  %v371_v53 = vsel %vm228_vm2, %v215_v47, 0 }
 0x132   :  { %v190_v33 = vadd.f32 %v1116_v15, %v189_v31  ;;  %1199 = vmatprep.subr.bf16.mxu1 %v1489_v14  ;;  %v1192_v34 = vpop.f32.mrb[6].mxu0  ;;  %v279_v44 = vsel %vm228_vm2, %v213_v37, 0 }
 0x133   :  { %v192_v35 = vpop.f32.mrb[7].mxu0  ;;  %v210_v41 = vmax.f32 %v198_v32, 0.0  ;;  %v201_v54 = vadd.f32 %v1192_v34, %v1116_v15 }
 0x134   :  { %v208_v38 = vmax.f32 %v190_v33, 0.0  ;;  %v193_v48 = vadd.f32 %v1116_v15, %v192_v35 }
 0x135   :  { %v218_v46 = vpack.c.bf16 %v210_v41, %v210_v41  ;;  %v211_v58 = vmax.f32 %v201_v54, 0.0 }
 0x136   :  { %v216_v42 = vpack.c.bf16 %v208_v38, %v208_v38  ;;  %v209_v52 = vmax.f32 %v193_v48, 0.0 }
 0x137   :  { %1208 = vmatmul.mubr.msk.bf16.vlgmr.msra.gmra.mrb[8].mxu0 %vm228_vm2, %v222_v39  ;;  %v509_v51 = vsel %vm228_vm2, %v218_v46, 0  ;;  %v219_v60 = vpack.c.bf16 %v211_v58, %v211_v58 }
 0x138   :  { %1196 = vmatmul.mubr.msk.bf16.vlgmr.msra.gmra.mrb[0].mxu1 %vm228_vm2, %v220_v40  ;;  %v417_v45 = vsel %vm228_vm2, %v216_v42, 0  ;;  %1219 = vmatprep.mubr.msk.bf16.mxu0 %vm1490_vm1, %v1489_v14  ;;  %v217_v55 = vpack.c.bf16 %v209_v52, %v209_v52 }
 0x139   :  { %1200 = vmatpush3.bf16.xpose.msra.mxu1 %v279_v44  ;;  %1218 = vmatpush3.bf16.xpose.msra.mxu0 %v417_v45  ;;  %v555_v62 = vsel %vm228_vm2, %v219_v60, 0 }
 0x13a   :  { %1201 = vmatprep.mubr.msk.bf16.mxu1 %vm1490_vm1, %v1489_v14  ;;  %1211 = vmatprep.subr.bf16.mxu1 %v1489_v14  ;;  %v463_v59 = vsel %vm228_vm2, %v217_v55, 0 }
 0x13b   :  { %1229 = vmatprep.subr.bf16.mxu0 %v1489_v14 }
 0x140   :  { %1202 = vmatmul.mubr.msk.bf16.vlgmr.msra.gmra.mrb[4].mxu1 %vm228_vm2, %v221_v49  ;;  %1220 = vmatmul.mubr.msk.bf16.vlgmr.msra.gmra.mrb[12].mxu0 %vm228_vm2, %v224_v50 }
 0x141   :  { %1212 = vmatpush3.bf16.xpose.msra.mxu1 %v371_v53  ;;  %1230 = vmatpush3.bf16.xpose.msra.mxu0 %v509_v51 }
 0x142   :  { %1213 = vmatprep.mubr.msk.bf16.mxu1 %vm1490_vm1, %v1489_v14  ;;  %1231 = vmatprep.mubr.msk.bf16.mxu0 %vm1490_vm1, %v1489_v14 }
 0x143   :  { %1223 = vmatprep.subr.bf16.mxu1 %v1489_v14  ;;  %1241 = vmatprep.subr.bf16.mxu0 %v1489_v14 }
 0x148   :  { %1214 = vmatmul.mubr.msk.bf16.vlgmr.msra.gmra.mrb[8].mxu1 %vm228_vm2, %v223_v56  ;;  %1232 = vmatmul.mubr.msk.bf16.vlgmr.msra.gmra.mrb[16].mxu0 %vm228_vm2, %v226_v57 }
 0x149   :  { %1224 = vmatpush3.bf16.xpose.msra.mxu1 %v463_v59  ;;  %1225 = vmatprep.mubr.msk.bf16.mxu1 %vm1490_vm1, %v1489_v14 }
 0x14a   :  { %1235 = vmatprep.subr.bf16.mxu1 %v1489_v14  ;;  %1243 = vmatprep.mubr.msk.bf16.mxu0 %vm1490_vm1, %v1489_v14 }
 0x150   :  { %1226 = vmatmul.mubr.msk.bf16.vlgmr.msra.gmra.mrb[12].mxu1 %vm228_vm2, %v225_v61 }
 0x151   :  { %1236 = vmatpush3.bf16.xpose.msra.mxu1 %v555_v62  ;;  %1237 = vmatprep.mubr.msk.bf16.mxu1 %vm1490_vm1, %v1489_v14 }
 0x152   :  { %1247 = vmatprep.subr.bf16.mxu1 %v1489_v14 }
 0x158   :  { %1238 = vmatmul.mubr.msk.bf16.vlgmr.msra.gmra.mrb[16].mxu1 %vm228_vm2, %v227_v63 }
 0x159   :  { %1249 = vmatprep.mubr.msk.bf16.mxu1 %vm1490_vm1, %v1489_v14 }
 0x20a   :  { %v361_v0 = vpop.f32.mrb[8].mxu0 }
 0x20b   :  { %v269_v1 = vpop.f32.mrb[0].mxu1  ;;  %v604_v4 = vsel %vm597_vm3, %v361_v0, -inf  ;;  %v1209_v9 = vpop.f32.mrb[9].mxu0 }
 0x20c   :  { %605 = vmax.xlane.f32.xlu1 %v604_v4  ;;  %v1197_v10 = vpop.f32.mrb[1].mxu1  ;;  %v598_v13 = vsel %vm597_vm3, %v269_v1, -inf  ;;  %v364_v15 = vpop.f32.mrb[10].mxu0 }
 0x20d   :  { %599 = vmax.xlane.f32.xlu0 %v598_v13  ;;  %v272_v16 = vpop.f32.mrb[2].mxu1  ;;  %v1210_v17 = vpop.f32.mrb[11].mxu0 }
 0x20e   :  { %v1198_v18 = vpop.f32.mrb[3].mxu1 }
 0x213   :  { %v315_v19 = vpop.f32.mrb[4].mxu1  ;;  %v453_v20 = vpop.f32.mrb[12].mxu0 }
 0x214   :  { %v1203_v21 = vpop.f32.mrb[5].mxu1  ;;  %v601_v22 = vsel %vm597_vm3, %v315_v19, -inf  ;;  %v1221_v23 = vpop.f32.mrb[13].mxu0  ;;  %v610_v27 = vsel %vm597_vm3, %v453_v20, -inf }
 0x215   :  { %602 = vmax.xlane.f32.xlu0 %v601_v22  ;;  %v318_v24 = vpop.f32.mrb[6].mxu1  ;;  %v456_v25 = vpop.f32.mrb[14].mxu0 }
 0x216   :  { %v1204_v26 = vpop.f32.mrb[7].mxu1  ;;  %v1222_v28 = vpop.f32.mrb[15].mxu0 }
 0x219   :  { %611 = vmax.xlane.f32.xlu0 %v610_v27 }
 0x21b   :  { %v407_v29 = vpop.f32.mrb[8].mxu1  ;;  %v545_v30 = vpop.f32.mrb[16].mxu0 }
 0x21c   :  { %v1215_v31 = vpop.f32.mrb[9].mxu1  ;;  %v616_v32 = vsel %vm597_vm3, %v545_v30, -inf  ;;  %v607_v33 = vsel %vm597_vm3, %v407_v29, -inf  ;;  %v1233_v34 = vpop.f32.mrb[17].mxu0 }
 0x21d   :  { %617 = vmax.xlane.f32.xlu0 %v616_v32  ;;  %608 = vmax.xlane.f32.xlu1 %v607_v33  ;;  %v410_v35 = vpop.f32.mrb[10].mxu1  ;;  %v548_v36 = vpop.f32.mrb[18].mxu0  ;;  %v700_v32 = vsel %vm698_vm4, %v1580_v2, 0 }
 0x21e   :  { %v1216_v37 = vpop.f32.mrb[11].mxu1  ;;  %v1234_v38 = vpop.f32.mrb[19].mxu0  ;;  %1242 = vmatpush3.bf16.msra.mxu0 %v700_v32  ;;  %v746_v35 = vsel %vm698_vm4, %v1582_v3, 0  ;;  %v792_v3 = vsel %vm698_vm4, %v1586_v5, 0 }
 0x21f   :  { %1253 = vmatprep.subr.bf16.mxu0 %v1489_v14  ;;  %1248 = vmatpush3.bf16.msra.mxu1 %v746_v35 }
 0x220   :  { %1259 = vmatprep.subr.bf16.mxu1 %v1489_v14 }
 0x223   :  { %v499_v39 = vpop.f32.mrb[12].mxu1 }
 0x224   :  { %v1227_v40 = vpop.f32.mrb[13].mxu1  ;;  %v613_v41 = vsel %vm597_vm3, %v499_v39, -inf }
 0x225   :  { %614 = vmax.xlane.f32.xlu1 %v613_v41  ;;  %v502_v42 = vpop.f32.mrb[14].mxu1 }
 0x226   :  { %v1228_v43 = vpop.f32.mrb[15].mxu1 }
 0x22b   :  { %v591_v44 = vpop.f32.mrb[16].mxu1 }
 0x22c   :  { %v1239_v45 = vpop.f32.mrb[17].mxu1  ;;  %v619_v46 = vsel %vm597_vm3, %v591_v44, -inf }
 0x22d   :  { %620 = vmax.xlane.f32.xlu1 %v619_v46  ;;  %v594_v47 = vpop.f32.mrb[18].mxu1 }
 0x22e   :  { %v1240_v48 = vpop.f32.mrb[19].mxu1 }
 0x299   :  { %v606_v49 = vpop.xlane.xlu1 %605 }
 0x29a   :  { %v624_v50 = vsub.f32 %v361_v0, %v606_v49  ;;  %v600_v51 = vpop.xlane.xlu0 %599  ;;  %v838_v49 = vsel %vm698_vm4, %v1588_v6, 0 }
 0x29b   :  { %v622_v52 = vsub.f32 %v269_v1, %v600_v51 }
 0x29c   :  { %v634_v53 = vmul.f32 1.442695, %v624_v50  ;;  %v884_v50 = vsel %vm698_vm4, %v1590_v7, 0 }
 0x29d   :  { %v630_v54 = vmul.f32 1.442695, %v622_v52 }
 0x29f   :  { %1307 = vpow2.f32 %v630_v54 }
 0x2a0   :  { %1309 = vpow2.f32 %v634_v53 }
 0x2a2   :  { %v603_v55 = vpop.xlane.xlu0 %602 }
 0x2a3   :  { %v623_v56 = vsub.f32 %v315_v19, %v603_v55 }
 0x2a5   :  { %v632_v57 = vmul.f32 1.442695, %v623_v56 }
 0x2a6   :  { %v612_v58 = vpop.xlane.xlu0 %611 }
 0x2a7   :  { %1311 = vpow2.f32 %v632_v57  ;;  %v626_v59 = vsub.f32 %v453_v20, %v612_v58  ;;  %v976_v57 = vsel %vm698_vm4, %v1601_v11, 0 }
 0x2a9   :  { %v1308_v60 = vpop.eup %1307  ;;  %v638_v61 = vmul.f32 1.442695, %v626_v59  ;;  %v930_v59 = vsel %vm698_vm4, %v1592_v8, 0 }
 0x2aa   :  { %v618_v62 = vpop.xlane.xlu0 %617  ;;  %v609_v63 = vpop.xlane.xlu1 %608  ;;  %v646_v4 = vsel %vm597_vm3, %v1308_v60, 0.0 }
 0x2ab   :  { %v1310_v9 = vpop.eup %1309  ;;  %1313 = vpow2.f32 %v638_v61  ;;  %v628_v0 = vsub.f32 %v545_v30, %v618_v62  ;;  %v625_v1 = vsub.f32 %v407_v29, %v609_v63  ;;  %647 = vadd.xlane.f32.xlu0 %v646_v4  ;;  %v1022_v63 = vsel %vm698_vm4, %v1603_v12, 0 }
 0x2ac   :  { %v652_v15 = vsel %vm597_vm3, %v1310_v9, 0.0 }
 0x2ad   :  { %v642_v10 = vmul.f32 1.442695, %v628_v0  ;;  %v636_v13 = vmul.f32 1.442695, %v625_v1 }
 0x2af   :  { %1315 = vpow2.f32 %v642_v10  ;;  %653 = vadd.xlane.f32.xlu0 %v652_v15 }
 0x2b0   :  { %1317 = vpow2.f32 %v636_v13 }
 0x2b1   :  { %v1312_v16 = vpop.eup %1311 }
 0x2b2   :  { %v615_v17 = vpop.xlane.xlu1 %614  ;;  %v649_v18 = vsel %vm597_vm3, %v1312_v16, 0.0 }
 0x2b3   :  { %v627_v19 = vsub.f32 %v499_v39, %v615_v17  ;;  %650 = vadd.xlane.f32.xlu1 %v649_v18 }
 0x2b5   :  { %v1314_v20 = vpop.eup %1313  ;;  %v640_v21 = vmul.f32 1.442695, %v627_v19 }
 0x2b6   :  { %v658_v22 = vsel %vm597_vm3, %v1314_v20, 0.0 }
 0x2b7   :  { %1319 = vpow2.f32 %v640_v21  ;;  %659 = vadd.xlane.f32.xlu0 %v658_v22 }
 0x2b9   :  { %v1666_v23 = vpop.eup %1315 }
 0x2ba   :  { %v1668_v24 = vpop.eup %1317  ;;  %v621_v25 = vpop.xlane.xlu1 %620  ;;  %v664_v26 = vsel %vm597_vm3, %v1666_v23, 0.0 }
 0x2bb   :  { %v629_v27 = vsub.f32 %v591_v44, %v621_v25  ;;  %665 = vadd.xlane.f32.xlu0 %v664_v26  ;;  %v655_v28 = vsel %vm597_vm3, %v1668_v24, 0.0 }
 0x2bc   :  { %656 = vadd.xlane.f32.xlu1 %v655_v28 }
 0x2bd   :  { %v644_v29 = vmul.f32 1.442695, %v629_v27 }
 0x2bf   :  { %1321 = vpow2.f32 %v644_v29 }
 0x2c1   :  { %v1674_v30 = vpop.eup %1319 }
 0x2c2   :  { %v661_v31 = vsel %vm597_vm3, %v1674_v30, 0.0 }
 0x2c3   :  { %662 = vadd.xlane.f32.xlu1 %v661_v31 }
 0x2c9   :  { %v1681_v33 = vpop.eup %1321 }
 0x2ca   :  { %v667_v34 = vsel %vm597_vm3, %v1681_v33, 0.0 }
 0x2cb   :  { %668 = vadd.xlane.f32.xlu1 %v667_v34 }
 0x338   :  { %v648_v36 = vpop.xlane.xlu0 %647 }
 0x339   :  { %1323 = vrcp.f32 %v648_v36 }
 0x33c   :  { %v654_v37 = vpop.xlane.xlu0 %653 }
 0x33d   :  { %1325 = vrcp.f32 %v654_v37 }
 0x340   :  { %v651_v2 = vpop.xlane.xlu1 %650 }
 0x341   :  { %1327 = vrcp.f32 %v651_v2 }
 0x343   :  { %v1324_v38 = vpop.eup %1323 }
 0x344   :  { %v678_v39 = vmul.f32 %v1324_v38, %v1308_v60  ;;  %v660_v40 = vpop.xlane.xlu0 %659 }
 0x345   :  { %1329 = vrcp.f32 %v660_v40 }
 0x346   :  { %1064 = vst.msk [vmem:[#allocation10] sm:$0x1] %vm597_vm3, %v678_v39  ;;  %v686_v41 = vpack.c.bf16 %v678_v39, %v678_v39 }
 0x347   :  { %v1326_v42 = vpop.eup %1325 }
 0x348   :  { %v680_v43 = vmul.f32 %v1326_v42, %v1310_v9  ;;  %1244 = vmatmul.mubr.msk.bf16.vlgmr.msra.gmra.mrb[20].mxu0 %vm694_vm5, %v686_v41  ;;  %v666_v44 = vpop.xlane.xlu0 %665 }
 0x349   :  { %1331 = vrcp.f32 %v666_v44  ;;  %v657_v45 = vpop.xlane.xlu1 %656  ;;  %1254 = vmatpush3.bf16.msra.mxu0 %v792_v3  ;;  %1255 = vmatprep.mubr.msk.bf16.mxu0 %vm1490_vm1, %v1489_v14 }
 0x34a   :  { %1066 = vst.msk [vmem:[#allocation10 + $0x2] sm:$0x1] %vm597_vm3, %v680_v43  ;;  %1333 = vrcp.f32 %v657_v45  ;;  %1265 = vmatprep.subr.bf16.mxu0 %v1489_v14  ;;  %v688_v48 = vpack.c.bf16 %v680_v43, %v680_v43 }
 0x34b   :  { %v1328_v46 = vpop.eup %1327 }
 0x34c   :  { %v679_v47 = vmul.f32 %v1328_v46, %v1312_v16 }
 0x34e   :  { %1065 = vst.msk [vmem:[#allocation10 + $0x1] sm:$0x1] %vm597_vm3, %v679_v47  ;;  %v687_v5 = vpack.c.bf16 %v679_v47, %v679_v47 }
 0x34f   :  { %v1330_v51 = vpop.eup %1329 }
 0x350   :  { %v682_v52 = vmul.f32 %v1330_v51, %v1314_v20  ;;  %1250 = vmatmul.mubr.msk.bf16.vlgmr.msra.gmra.mrb[20].mxu1 %vm694_vm5, %v687_v5  ;;  %1256 = vmatmul.mubr.msk.bf16.vlgmr.msra.gmra.mrb[24].mxu0 %vm694_vm5, %v688_v48  ;;  %v663_v53 = vpop.xlane.xlu1 %662 }
 0x351   :  { %1335 = vrcp.f32 %v663_v53  ;;  %1260 = vmatpush3.bf16.msra.mxu1 %v838_v49  ;;  %1266 = vmatpush3.bf16.msra.mxu0 %v884_v50 }
 0x352   :  { %1068 = vst.msk [vmem:[#allocation10 + $0x4] sm:$0x1] %vm597_vm3, %v682_v52  ;;  %1261 = vmatprep.mubr.msk.bf16.mxu1 %vm1490_vm1, %v1489_v14  ;;  %1267 = vmatprep.mubr.msk.bf16.mxu0 %vm1490_vm1, %v1489_v14  ;;  %v690_v56 = vpack.c.bf16 %v682_v52, %v682_v52 }
 0x353   :  { %v1332_v6 = vpop.eup %1331  ;;  %1271 = vmatprep.subr.bf16.mxu1 %v1489_v14  ;;  %1277 = vmatprep.subr.bf16.mxu0 %v1489_v14 }
 0x354   :  { %v1334_v7 = vpop.eup %1333  ;;  %v684_v54 = vmul.f32 %v1332_v6, %v1666_v23 }
 0x355   :  { %v681_v55 = vmul.f32 %v1334_v7, %v1668_v24 }
 0x356   :  { %1070 = vst.msk [vmem:[#allocation10 + $0x6] sm:$0x1] %vm597_vm3, %v684_v54  ;;  %v692_v62 = vpack.c.bf16 %v684_v54, %v684_v54 }
 0x357   :  { %1067 = vst.msk [vmem:[#allocation10 + $0x3] sm:$0x1] %vm597_vm3, %v681_v55  ;;  %v689_v58 = vpack.c.bf16 %v681_v55, %v681_v55 }
 0x358   :  { %1268 = vmatmul.mubr.msk.bf16.vlgmr.msra.gmra.mrb[28].mxu0 %vm694_vm5, %v690_v56  ;;  %v669_v60 = vpop.xlane.xlu1 %668 }
 0x359   :  { %1262 = vmatmul.mubr.msk.bf16.vlgmr.msra.gmra.mrb[24].mxu1 %vm694_vm5, %v689_v58  ;;  %1337 = vrcp.f32 %v669_v60  ;;  %1278 = vmatpush3.bf16.msra.mxu0 %v976_v57 }
 0x35a   :  { %1272 = vmatpush3.bf16.msra.mxu1 %v930_v59  ;;  %1273 = vmatprep.mubr.msk.bf16.mxu1 %vm1490_vm1, %v1489_v14 }
 0x35b   :  { %v1336_v61 = vpop.eup %1335  ;;  %1279 = vmatprep.mubr.msk.bf16.mxu0 %vm1490_vm1, %v1489_v14  ;;  %1283 = vmatprep.subr.bf16.mxu1 %v1489_v14 }
 0x35c   :  { %v683_v11 = vmul.f32 %v1336_v61, %v1674_v30 }
 0x35e   :  { %1069 = vst.msk [vmem:[#allocation10 + $0x5] sm:$0x1] %vm597_vm3, %v683_v11  ;;  %v691_v8 = vpack.c.bf16 %v683_v11, %v683_v11 }
 0x360   :  { %1280 = vmatmul.mubr.msk.bf16.vlgmr.msra.gmra.mrb[32].mxu0 %vm694_vm5, %v692_v62 }
 0x361   :  { %1274 = vmatmul.mubr.msk.bf16.vlgmr.msra.gmra.mrb[28].mxu1 %vm694_vm5, %v691_v8 }
 0x362   :  { %1284 = vmatpush3.bf16.msra.mxu1 %v1022_v63  ;;  %1285 = vmatprep.mubr.msk.bf16.mxu1 %vm1490_vm1, %v1489_v14 }
 0x363   :  { %v1338_v4 = vpop.eup %1337 }
 0x364   :  { %v685_v9 = vmul.f32 %v1338_v4, %v1681_v33 }
 0x366   :  { %1071 = vst.msk [vmem:[#allocation10 + $0x7] sm:$0x1] %vm597_vm3, %v685_v9  ;;  %v693_v0 = vpack.c.bf16 %v685_v9, %v685_v9 }
 0x369   :  { %1286 = vmatmul.mubr.msk.bf16.vlgmr.msra.gmra.mrb[32].mxu1 %vm694_vm5, %v693_v0 }
 0x36a   :  { %1438 = shalt.err (!%p1435_p8)
}
 0x36b   :  { %s1439_s23 = scalar_lea.hbm %s1778_s4, 128 }
 0x36c   :  { %p1440_p9 = scmp.ne.s32.totalorder %s1778_s4, %s1439_s23  ;;  %p1443_p10 = scmp.lt.u32.totalorder %s1439_s23, %s1778_s4 }
 0x36e   :  { %p1445_p11 = pnand %p1443_p10, %p1440_p9 }
 0x370   :  { %1448 = shalt.err (!%p1445_p11)
}
 0x371   :  { %1092 = dma.vmem_to_hbm [thread:$0]  %s1087_s29, 128, %s1778_s4, [#allocation4], %s1485_s1, %s1485_s1, %s1486_s17   ;;  %vm1072_vm6 = vcmask 253952  }
 0x372   :  { %s1492_s4 = smov [#allocation11]  }
 0x373   :  { %s1098_s7 = sshll.u32 %s1492_s4, 4  ;;  %s1099_s7 = int_to_ptr.vmem [resolvable:$true] %s1098_s7 }
 0x374   :  { %s1449_s0 = scalar_lea.vmem %s1099_s7, 128  ;;  %p1454_p13 = scmp.lt.s32.totalorder %s1099_s7, %s1099_s7 }
 0x375   :  { %p1450_p12 = scmp.ne.s32.totalorder %s1099_s7, %s1449_s0  ;;  %p1455_p0 = scmp.lt.s32.totalorder %s1449_s0, %s1449_s0 }
 0x377   :  { %p1456_p1 = por %p1455_p0, %p1454_p13 }
 0x379   :  { %p1457_p2 = pnand %p1456_p1, %p1450_p12 }
 0x41b   :  { %v736_v12 = vpop.f32.mrb[20].mxu0 }
 0x41c   :  { %1073 = vst.msk [vmem:[#allocation11] sm:$0x1] %vm1072_vm6, %v736_v12  ;;  %v1245_v14 = vpop.f32.mrb[21].mxu0 }
 0x41d   :  { %v739_v1 = vpop.f32.mrb[22].mxu0 }
 0x41e   :  { %v1246_v10 = vpop.f32.mrb[23].mxu0 }
 0x423   :  { %v782_v13 = vpop.f32.mrb[20].mxu1  ;;  %v828_v15 = vpop.f32.mrb[24].mxu0 }
 0x424   :  { %1074 = vst.msk [vmem:[#allocation11 + $0x1] sm:$0x1] %vm1072_vm6, %v782_v13  ;;  %1075 = vst.msk [vmem:[#allocation11 + $0x2] sm:$0x1] %vm1072_vm6, %v828_v15  ;;  %v1251_v16 = vpop.f32.mrb[21].mxu1  ;;  %v1257_v17 = vpop.f32.mrb[25].mxu0 }
 0x425   :  { %v785_v18 = vpop.f32.mrb[22].mxu1  ;;  %v831_v19 = vpop.f32.mrb[26].mxu0 }
 0x426   :  { %v1252_v20 = vpop.f32.mrb[23].mxu1  ;;  %v1258_v21 = vpop.f32.mrb[27].mxu0 }
 0x42b   :  { %v920_v22 = vpop.f32.mrb[28].mxu0 }
 0x42c   :  { %v874_v23 = vpop.f32.mrb[24].mxu1  ;;  %1077 = vst.msk [vmem:[#allocation11 + $0x4] sm:$0x1] %vm1072_vm6, %v920_v22  ;;  %v1269_v24 = vpop.f32.mrb[29].mxu0 }
 0x42d   :  { %1076 = vst.msk [vmem:[#allocation11 + $0x3] sm:$0x1] %vm1072_vm6, %v874_v23  ;;  %v1263_v25 = vpop.f32.mrb[25].mxu1  ;;  %v923_v26 = vpop.f32.mrb[30].mxu0 }
 0x42e   :  { %v877_v27 = vpop.f32.mrb[26].mxu1  ;;  %v1270_v28 = vpop.f32.mrb[31].mxu0 }
 0x42f   :  { %v1264_v29 = vpop.f32.mrb[27].mxu1 }
 0x433   :  { %v1012_v30 = vpop.f32.mrb[32].mxu0 }
 0x434   :  { %v966_v31 = vpop.f32.mrb[28].mxu1  ;;  %1079 = vst.msk [vmem:[#allocation11 + $0x6] sm:$0x1] %vm1072_vm6, %v1012_v30  ;;  %v1281_v32 = vpop.f32.mrb[33].mxu0 }
 0x435   :  { %1078 = vst.msk [vmem:[#allocation11 + $0x5] sm:$0x1] %vm1072_vm6, %v966_v31  ;;  %v1275_v33 = vpop.f32.mrb[29].mxu1  ;;  %v1015_v34 = vpop.f32.mrb[34].mxu0 }
 0x436   :  { %v969_v35 = vpop.f32.mrb[30].mxu1  ;;  %v1282_v36 = vpop.f32.mrb[35].mxu0 }
 0x437   :  { %v1276_v37 = vpop.f32.mrb[31].mxu1 }
 0x43c   :  { %v1058_v2 = vpop.f32.mrb[32].mxu1 }
 0x43d   :  { %1080 = vst.msk [vmem:[#allocation11 + $0x7] sm:$0x1] %vm1072_vm6, %v1058_v2  ;;  %v1287_v38 = vpop.f32.mrb[33].mxu1 }
 0x43e   :  { %v1061_v39 = vpop.f32.mrb[34].mxu1 }
 0x43f   :  { %1460 = shalt.err (!%p1457_p2)
}
 0x440   :  { %s1461_s10 = scalar_lea.hbm %s1779_s5, 128 }
 0x441   :  { %p1462_p3 = scmp.ne.s32.totalorder %s1779_s5, %s1461_s10  ;;  %p1465_p4 = scmp.lt.u32.totalorder %s1461_s10, %s1779_s5 }
 0x443   :  { %p1467_p5 = pnand %p1465_p4, %p1462_p3 }
 0x445   :  { %1470 = shalt.err (!%p1467_p5)
}
 0x446   :  { %1104 = dma.vmem_to_hbm [thread:$0]  %s1099_s7, 128, %s1779_s5, [#allocation12], %s1485_s1, %s1485_s1, %s1486_s17   ;;  %v1288_v40 = vpop.f32.mrb[35].mxu1 }
 0x447   :  { %1477 = dma.done.wait [#allocation4], 128  }
 0x448   :  { %1478 = vsyncadd [#allocation4], 4294967168 }
 0x449   :  { %1479 = dma.done.wait [#allocation12], 128  }
 0x44a   :  { %1480 = vsyncadd [#allocation12], 4294967168 }
 0x44b   :  { %1111 = vsyncpa [#allocation3], 1 }
 0x44c   :  { %1112 = vsyncpa [#allocation6], 1 }
 0x44d   :  { %1113 = vsyncpa [#allocation9], 1 }
 0x44e   :  { %1114 = vsyncpa [#allocation4], 1 }
 0x44f   :  { %1115 = vsyncpa [#allocation12], 1 }

</bundles_post_ra>
